<compile_context>
chip_gen: v6e
topology: v6e:2x2x1
jax: 0.10.0
libtpu: 0.0.40
codegen_flags: <defaults>
</compile_context>

<pallas_src>
import functools

import jax
import jax.numpy as jnp
from jax import lax
from jax.experimental import pallas as pl
from jax.experimental.pallas import tpu as pltpu


# ---------------------------------------------------------------------------
# Kernel
# ---------------------------------------------------------------------------
def _bottleneck_kernel(B, H, W, C, dilations, pmax,
                       x_ref, bwk_ref, b_ref, out_ref, pad_ref):
    """Fused 4-layer dilated-conv bottleneck for a block of B samples.

    x_ref   : (B*H, W*C)        lane-dense input block (layer-1 channels zero-padded to C)
    bwk_ref : (L, 3*W*C, W*C)   bf16 banded weights; the 3 kh taps stacked along K
    b_ref   : (L, 1, W*C)       per-layer bias, tiled over w
    out_ref : (B*H, W*C)        o1 + o2 + ... + oL  (f32)
    pad_ref : (B, H+2*pmax, W*C) zero-haloed activation scratch shared by all layers
    """
    Hp = H + 2 * pmax
    WC = W * C
    M = B * H
    n_layers = len(dilations)

    # Zero only the halo rows (2*pmax rows per sample) — the interiors are always
    # written before they are read.  Unconditional: safe under megacore splitting.
    pad_ref[:, 0:pmax, :] = jnp.zeros((B, pmax, WC), jnp.float32)
    pad_ref[:, pmax + H:Hp, :] = jnp.zeros((B, pmax, WC), jnp.float32)
    # Interior <- layer-1 input.
    pad_ref[:, pmax:pmax + H, :] = x_ref[...].reshape(B, H, WC)

    total = jnp.zeros((M, WC), jnp.float32)

    for l, d in enumerate(dilations):
        # Three h-shifted views of the haloed activations, concatenated along lanes
        # -> one (M, 3*WC) LHS and a single matmul per layer.
        taps = []
        for kh in range(3):
            off = pmax + (kh - 1) * d      # static offset into the haloed buffer
            taps.append(pad_ref[:, off:off + H, :].reshape(M, WC))
        lhs = jnp.concatenate(taps, axis=-1).astype(jnp.bfloat16)   # (M, 3*WC)

        y = jnp.dot(lhs, bwk_ref[l], preferred_element_type=jnp.float32)
        y = jnp.maximum(y + b_ref[l], 0.0)                          # bias + ReLU, f32
        total = total + y

        if l + 1 < n_layers:
            # This layer's output becomes the next layer's (interior) input.
            # (Loads above already produced values, so overwriting is safe.)
            pad_ref[:, pmax:pmax + H, :] = y.reshape(B, H, WC)

    out_ref[...] = total


# ---------------------------------------------------------------------------
# Weight preparation (run once per weight update, NOT per forward)
# ---------------------------------------------------------------------------
def _banded_weights_kfused(w_hwio, dilation, W, C):
    """Fold kw taps + channel mixing + w-zero-padding into a banded matrix, with
    the 3 kh taps stacked along K.

    Returns (3*W*C, W*C):
      BW[kh*W*C + w_in*C + ci, w_out*C + co] = K[kh, kw, ci, co]
        if w_in == w_out + (kw-1)*dilation (in range), else 0.
    Input channels are zero-padded up to C.
    """
    _, _, cin, cout = w_hwio.shape
    assert cout == C and cin <= C, "module guarantees in_ch <= out_ch"
    wpad = jnp.zeros((3, 3, C, C), jnp.float32).at[:, :, :cin, :].set(w_hwio)

    idx = jnp.arange(W)
    blocks = []
    for kh in range(3):
        bw = jnp.zeros((W * C, W * C), jnp.float32)
        for kw in range(3):
            off = (kw - 1) * dilation
            mask = (idx[:, None] == idx[None, :] + off).astype(jnp.float32)  # (w_in, w_out)
            bw = bw + jnp.kron(mask, wpad[kh, kw])
        blocks.append(bw)
    return jnp.concatenate(blocks, axis=0)          # (3*W*C, W*C)


def prepare_bottleneck(params, W):
    """Precompute bf16 banded weights + tiled f32 biases once."""
    cout = params[0][0].shape[-1]
    dilations = tuple(int(d) for (_, _, d) in params)
    bwk = jnp.stack([_banded_weights_kfused(w, d, W, cout)
                     for (w, _, d) in params]).astype(jnp.bfloat16)          # (L, 3WC, WC)
    bias = jnp.stack([jnp.tile(b.reshape(1, cout), (1, W))
                      for (_, b, _) in params]).astype(jnp.float32)          # (L, 1, WC)
    return {"bwk": bwk, "bias": bias, "dilations": dilations,
            "Cin": params[0][0].shape[2], "Cout": cout, "W": W}


# ---------------------------------------------------------------------------
# Forward wrappers
# ---------------------------------------------------------------------------
def _pick_batch_block(N, H):
    """Pick samples-per-grid-step: aim for ~256 matmul rows, keep >=2 grid programs
    (v7x has 2 TensorCores) when that doesn't shrink M below 128."""
    target = max(1, 256 // H)
    best = 1
    for b in range(1, N + 1):
        if N % b == 0 and b <= target:
            best = b
    if N // best < 2:
        for b in range(best - 1, 0, -1):
            if N % b == 0 and b * H >= 128:
                best = b
                break
    return best


def bottleneck_forward_nhwc(x_nhwc, prep):
    """NHWC in / NHWC out. The only layout work here is a free reshape."""
    N, H, W, Cin = x_nhwc.shape
    Cout = prep["Cout"]
    dilations = prep["dilations"]
    pmax = max(dilations)
    WC = W * Cout
    assert W == prep["W"] and Cin == prep["Cin"] and Cin <= Cout

    if Cin < Cout:  # zero-pad input channels so every layer shares lane width W*Cout
        x_nhwc = jnp.pad(x_nhwc, ((0, 0), (0, 0), (0, 0), (0, Cout - Cin)))
    x2d = x_nhwc.astype(jnp.float32).reshape(N * H, WC)

    B = _pick_batch_block(N, H)
    grid = (N // B,)

    kernel = functools.partial(_bottleneck_kernel, B, H, W, Cout, dilations, pmax)

    out2d = pl.pallas_call(
        kernel,
        out_shape=jax.ShapeDtypeStruct((N * H, WC), jnp.float32),
        grid=grid,
        in_specs=[
            pl.BlockSpec((B * H, WC), lambda n: (n, 0)),
            pl.BlockSpec(prep["bwk"].shape, lambda n: (0, 0, 0)),   # constant: fetched once
            pl.BlockSpec(prep["bias"].shape, lambda n: (0, 0, 0)),
        ],
        out_specs=pl.BlockSpec((B * H, WC), lambda n: (n, 0)),
        scratch_shapes=[pltpu.VMEM((B, H + 2 * pmax, WC), jnp.float32)],
        compiler_params=pltpu.CompilerParams(dimension_semantics=("parallel",)),
    )(x2d, prep["bwk"], prep["bias"])

    return out2d.reshape(N, H, W, Cout)


def bottleneck_forward(x_nchw, prep):
    """NCHW adapter matching the PyTorch module interface."""
    x_nhwc = jnp.transpose(x_nchw, (0, 2, 3, 1))
    out_nhwc = bottleneck_forward_nhwc(x_nhwc, prep)
    return jnp.transpose(out_nhwc, (0, 3, 1, 2))


# ---------------------------------------------------------------------------
# Parameters + pure-JAX reference
# ---------------------------------------------------------------------------
def init_bottleneck_params(key, filters=4, n_block=1, depth=4):
    """Deterministic synthetic parameters mirroring Bottleneck.__init__ shapes."""
    out_ch = filters * 2 ** n_block
    in_ch = filters * 2 ** (n_block - 1)
    params = []
    for i in range(depth):
        dilate = 2 ** i
        key, kw, kb = jax.random.split(key, 3)
        w = 0.1 * jax.random.normal(kw, (3, 3, in_ch, out_ch), jnp.float32)  # HWIO
        b = 0.1 * jax.random.normal(kb, (1, out_ch), jnp.float32)
        params.append((w, b, dilate))
        if i == 0:
            in_ch = out_ch
    return params


def bottleneck_reference(x_nchw, params):
    """Pure-JAX reference (lax.conv_general_dilated), f32 throughout."""
    x = jnp.transpose(x_nchw, (0, 2, 3, 1)).astype(jnp.float32)
    total = 0.0
    out = x
    for (w, b, d) in params:
        y = lax.conv_general_dilated(
            out, w, window_strides=(1, 1), padding=[(d, d), (d, d)],
            rhs_dilation=(d, d),
            dimension_numbers=('NHWC', 'HWIO', 'NHWC'))
        y = jnp.maximum(y + b.reshape(1, 1, 1, -1), 0.0)
        total = total + y
        out = y
    return jnp.transpose(total, (0, 3, 1, 2))


if __name__ == "__main__":
    # Shapes consistent with the module at small scale: filters=4, n_block=1, depth=4
    # -> in_ch = 4, out_ch = 8, dilations 1,2,4,8; x is NCHW (2, 4, 16, 16).
    key = jax.random.PRNGKey(0)
    key_x, key_p = jax.random.split(key)

    x = jax.random.normal(key_x, (2, 4, 16, 16), jnp.float32)
    params = init_bottleneck_params(key_p, filters=4, n_block=1, depth=4)

    prep = prepare_bottleneck(params, W=16)          # banded bf16 weights, built once

    out = jax.block_until_ready(bottleneck_forward(x, prep))
    ref = jax.block_until_ready(bottleneck_reference(x, params))

    assert out.shape == ref.shape == (2, 8, 16, 16)
    # bf16 matmul operands (f32 accumulate) -> loosened tolerance vs the f32 reference.
    assert jnp.allclose(out, ref, atol=2e-2, rtol=2e-2), (
        "mismatch vs reference, max abs err = %f" % float(jnp.max(jnp.abs(out - ref))))

    print("KERNEL_OK")
</pallas_src>

<mosaic_0001>
module attributes {stable_mosaic.version = 11 : i64} {
  func.func @_bottleneck_kernel(%arg0: i32, %arg1: memref<32x128xf32, #tpu.memory_space<vmem>>, %arg2: memref<4x384x128xbf16, #tpu.memory_space<vmem>>, %arg3: memref<4x1x128xf32, #tpu.memory_space<vmem>>, %arg4: memref<32x128xf32, #tpu.memory_space<vmem>>, %arg5: memref<2x32x128xf32, #tpu.memory_space<vmem>>) attributes {dimension_semantics = [#tpu.dimension_semantics<parallel>], iteration_bounds = array<i64: 1>, scalar_prefetch = 0 : i64, scratch_operands = 1 : i64, tpu.core_type = #tpu.core_type<tc>, window_params = [{transform_indices = @transform_0, window_bounds = array<i64: 32, 128>}, {pipeline_mode = #tpu.pipeline_mode<synchronous>, transform_indices = @transform_1, window_bounds = array<i64: 4, 384, 128>}, {pipeline_mode = #tpu.pipeline_mode<synchronous>, transform_indices = @transform_2, window_bounds = array<i64: 4, 1, 128>}, {transform_indices = @transform_3, window_bounds = array<i64: 32, 128>}]} {
    %cst = arith.constant 0.000000e+00 : f32
    %0 = vector.broadcast %cst : f32 to vector<2x8x128xf32>
    %c0 = arith.constant 0 : index
    %c0_0 = arith.constant 0 : index
    %c0_1 = arith.constant 0 : index
    %1 = vector.load %arg5[%c0, %c0_0, %c0_1] : memref<2x32x128xf32, #tpu.memory_space<vmem>>, vector<2x8x128xf32>
    tpu.vector_store %arg5[%c0, %c0_0, %c0_1], %0 {strides = array<i32>} : memref<2x32x128xf32, #tpu.memory_space<vmem>>, vector<2x8x128xf32>,
    %cst_2 = arith.constant 0.000000e+00 : f32
    %2 = vector.broadcast %cst_2 : f32 to vector<2x8x128xf32>
    %c0_3 = arith.constant 0 : index
    %c24 = arith.constant 24 : index
    %c0_4 = arith.constant 0 : index
    %3 = vector.load %arg5[%c0_3, %c24, %c0_4] : memref<2x32x128xf32, #tpu.memory_space<vmem>>, vector<2x8x128xf32>
    tpu.vector_store %arg5[%c0_3, %c24, %c0_4], %2 {strides = array<i32>} : memref<2x32x128xf32, #tpu.memory_space<vmem>>, vector<2x8x128xf32>,
    %c0_5 = arith.constant 0 : index
    %c0_6 = arith.constant 0 : index
    %4 = vector.load %arg1[%c0_5, %c0_6] : memref<32x128xf32, #tpu.memory_space<vmem>>, vector<32x128xf32>
    %5 = vector.shape_cast %4 : vector<32x128xf32> to vector<2x16x128xf32>
    %c0_7 = arith.constant 0 : index
    %c8 = arith.constant 8 : index
    %c0_8 = arith.constant 0 : index
    %6 = vector.load %arg5[%c0_7, %c8, %c0_8] : memref<2x32x128xf32, #tpu.memory_space<vmem>>, vector<2x16x128xf32>
    tpu.vector_store %arg5[%c0_7, %c8, %c0_8], %5 {strides = array<i32>} : memref<2x32x128xf32, #tpu.memory_space<vmem>>, vector<2x16x128xf32>,
    %cst_9 = arith.constant 0.000000e+00 : f32
    %7 = vector.broadcast %cst_9 : f32 to vector<32x128xf32>
    %c0_10 = arith.constant 0 : index
    %c7 = arith.constant 7 : index
    %c0_11 = arith.constant 0 : index
    %8 = vector.load %arg5[%c0_10, %c7, %c0_11] : memref<2x32x128xf32, #tpu.memory_space<vmem>>, vector<2x16x128xf32>
    %9 = vector.shape_cast %8 : vector<2x16x128xf32> to vector<32x128xf32>
    %c0_12 = arith.constant 0 : index
    %c8_13 = arith.constant 8 : index
    %c0_14 = arith.constant 0 : index
    %10 = vector.load %arg5[%c0_12, %c8_13, %c0_14] : memref<2x32x128xf32, #tpu.memory_space<vmem>>, vector<2x16x128xf32>
    %11 = vector.shape_cast %10 : vector<2x16x128xf32> to vector<32x128xf32>
    %c0_15 = arith.constant 0 : index
    %c9 = arith.constant 9 : index
    %c0_16 = arith.constant 0 : index
    %12 = vector.load %arg5[%c0_15, %c9, %c0_16] : memref<2x32x128xf32, #tpu.memory_space<vmem>>, vector<2x16x128xf32>
    %13 = vector.shape_cast %12 : vector<2x16x128xf32> to vector<32x128xf32>
    %14 = tpu.concatenate %9, %11, %13 in 1 : vector<32x128xf32>, vector<32x128xf32>, vector<32x128xf32> -> vector<32x384xf32>
    %15 = arith.truncf %14 : vector<32x384xf32> to vector<32x384xbf16>
    %c0_17 = arith.constant 0 : index
    %c0_18 = arith.constant 0 : index
    %c0_19 = arith.constant 0 : index
    %16 = vector.load %arg2[%c0_17, %c0_18, %c0_19] : memref<4x384x128xbf16, #tpu.memory_space<vmem>>, vector<1x384x128xbf16>
    %17 = vector.shape_cast %16 : vector<1x384x128xbf16> to vector<384x128xbf16>
    %cst_20 = arith.constant dense<0.000000e+00> : vector<32x128xf32>
    %18 = tpu.matmul %15, %17, %cst_20 {dimension_numbers = #tpu.dot_dimension_numbers<[1], [0], [0], [1], [0, 0, 1, 1], [], []>} : vector<32x384xbf16>, vector<384x128xbf16>, vector<32x128xf32> -> vector<32x128xf32>
    %c0_21 = arith.constant 0 : index
    %c0_22 = arith.constant 0 : index
    %c0_23 = arith.constant 0 : index
    %19 = vector.load %arg3[%c0_21, %c0_22, %c0_23] : memref<4x1x128xf32, #tpu.memory_space<vmem>>, vector<1x1x128xf32>
    %20 = vector.shape_cast %19 : vector<1x1x128xf32> to vector<1x128xf32>
    %21 = vector.broadcast %20 : vector<1x128xf32> to vector<32x128xf32>
    %22 = arith.addf %18, %21 : vector<32x128xf32>
    %cst_24 = arith.constant 0.000000e+00 : f32
    %23 = vector.broadcast %cst_24 : f32 to vector<32x128xf32>
    %24 = arith.maximumf %22, %23 : vector<32x128xf32>
    %25 = arith.addf %7, %24 : vector<32x128xf32>
    %26 = vector.shape_cast %24 : vector<32x128xf32> to vector<2x16x128xf32>
    %c0_25 = arith.constant 0 : index
    %c8_26 = arith.constant 8 : index
    %c0_27 = arith.constant 0 : index
    %27 = vector.load %arg5[%c0_25, %c8_26, %c0_27] : memref<2x32x128xf32, #tpu.memory_space<vmem>>, vector<2x16x128xf32>
    tpu.vector_store %arg5[%c0_25, %c8_26, %c0_27], %26 {strides = array<i32>} : memref<2x32x128xf32, #tpu.memory_space<vmem>>, vector<2x16x128xf32>,
    %c0_28 = arith.constant 0 : index
    %c6 = arith.constant 6 : index
    %c0_29 = arith.constant 0 : index
    %28 = vector.load %arg5[%c0_28, %c6, %c0_29] : memref<2x32x128xf32, #tpu.memory_space<vmem>>, vector<2x16x128xf32>
    %29 = vector.shape_cast %28 : vector<2x16x128xf32> to vector<32x128xf32>
    %c0_30 = arith.constant 0 : index
    %c8_31 = arith.constant 8 : index
    %c0_32 = arith.constant 0 : index
    %30 = vector.load %arg5[%c0_30, %c8_31, %c0_32] : memref<2x32x128xf32, #tpu.memory_space<vmem>>, vector<2x16x128xf32>
    %31 = vector.shape_cast %30 : vector<2x16x128xf32> to vector<32x128xf32>
    %c0_33 = arith.constant 0 : index
    %c10 = arith.constant 10 : index
    %c0_34 = arith.constant 0 : index
    %32 = vector.load %arg5[%c0_33, %c10, %c0_34] : memref<2x32x128xf32, #tpu.memory_space<vmem>>, vector<2x16x128xf32>
    %33 = vector.shape_cast %32 : vector<2x16x128xf32> to vector<32x128xf32>
    %34 = tpu.concatenate %29, %31, %33 in 1 : vector<32x128xf32>, vector<32x128xf32>, vector<32x128xf32> -> vector<32x384xf32>
    %35 = arith.truncf %34 : vector<32x384xf32> to vector<32x384xbf16>
    %c1 = arith.constant 1 : index
    %c0_35 = arith.constant 0 : index
    %c0_36 = arith.constant 0 : index
    %36 = vector.load %arg2[%c1, %c0_35, %c0_36] : memref<4x384x128xbf16, #tpu.memory_space<vmem>>, vector<1x384x128xbf16>
    %37 = vector.shape_cast %36 : vector<1x384x128xbf16> to vector<384x128xbf16>
    %cst_37 = arith.constant dense<0.000000e+00> : vector<32x128xf32>
    %38 = tpu.matmul %35, %37, %cst_37 {dimension_numbers = #tpu.dot_dimension_numbers<[1], [0], [0], [1], [0, 0, 1, 1], [], []>} : vector<32x384xbf16>, vector<384x128xbf16>, vector<32x128xf32> -> vector<32x128xf32>
    %c1_38 = arith.constant 1 : index
    %c0_39 = arith.constant 0 : index
    %c0_40 = arith.constant 0 : index
    %39 = vector.load %arg3[%c1_38, %c0_39, %c0_40] : memref<4x1x128xf32, #tpu.memory_space<vmem>>, vector<1x1x128xf32>
    %40 = vector.shape_cast %39 : vector<1x1x128xf32> to vector<1x128xf32>
    %41 = vector.broadcast %40 : vector<1x128xf32> to vector<32x128xf32>
    %42 = arith.addf %38, %41 : vector<32x128xf32>
    %cst_41 = arith.constant 0.000000e+00 : f32
    %43 = vector.broadcast %cst_41 : f32 to vector<32x128xf32>
    %44 = arith.maximumf %42, %43 : vector<32x128xf32>
    %45 = arith.addf %25, %44 : vector<32x128xf32>
    %46 = vector.shape_cast %44 : vector<32x128xf32> to vector<2x16x128xf32>
    %c0_42 = arith.constant 0 : index
    %c8_43 = arith.constant 8 : index
    %c0_44 = arith.constant 0 : index
    %47 = vector.load %arg5[%c0_42, %c8_43, %c0_44] : memref<2x32x128xf32, #tpu.memory_space<vmem>>, vector<2x16x128xf32>
    tpu.vector_store %arg5[%c0_42, %c8_43, %c0_44], %46 {strides = array<i32>} : memref<2x32x128xf32, #tpu.memory_space<vmem>>, vector<2x16x128xf32>,
    %c0_45 = arith.constant 0 : index
    %c4 = arith.constant 4 : index
    %c0_46 = arith.constant 0 : index
    %48 = vector.load %arg5[%c0_45, %c4, %c0_46] : memref<2x32x128xf32, #tpu.memory_space<vmem>>, vector<2x16x128xf32>
    %49 = vector.shape_cast %48 : vector<2x16x128xf32> to vector<32x128xf32>
    %c0_47 = arith.constant 0 : index
    %c8_48 = arith.constant 8 : index
    %c0_49 = arith.constant 0 : index
    %50 = vector.load %arg5[%c0_47, %c8_48, %c0_49] : memref<2x32x128xf32, #tpu.memory_space<vmem>>, vector<2x16x128xf32>
    %51 = vector.shape_cast %50 : vector<2x16x128xf32> to vector<32x128xf32>
    %c0_50 = arith.constant 0 : index
    %c12 = arith.constant 12 : index
    %c0_51 = arith.constant 0 : index
    %52 = vector.load %arg5[%c0_50, %c12, %c0_51] : memref<2x32x128xf32, #tpu.memory_space<vmem>>, vector<2x16x128xf32>
    %53 = vector.shape_cast %52 : vector<2x16x128xf32> to vector<32x128xf32>
    %54 = tpu.concatenate %49, %51, %53 in 1 : vector<32x128xf32>, vector<32x128xf32>, vector<32x128xf32> -> vector<32x384xf32>
    %55 = arith.truncf %54 : vector<32x384xf32> to vector<32x384xbf16>
    %c2 = arith.constant 2 : index
    %c0_52 = arith.constant 0 : index
    %c0_53 = arith.constant 0 : index
    %56 = vector.load %arg2[%c2, %c0_52, %c0_53] : memref<4x384x128xbf16, #tpu.memory_space<vmem>>, vector<1x384x128xbf16>
    %57 = vector.shape_cast %56 : vector<1x384x128xbf16> to vector<384x128xbf16>
    %cst_54 = arith.constant dense<0.000000e+00> : vector<32x128xf32>
    %58 = tpu.matmul %55, %57, %cst_54 {dimension_numbers = #tpu.dot_dimension_numbers<[1], [0], [0], [1], [0, 0, 1, 1], [], []>} : vector<32x384xbf16>, vector<384x128xbf16>, vector<32x128xf32> -> vector<32x128xf32>
    %c2_55 = arith.constant 2 : index
    %c0_56 = arith.constant 0 : index
    %c0_57 = arith.constant 0 : index
    %59 = vector.load %arg3[%c2_55, %c0_56, %c0_57] : memref<4x1x128xf32, #tpu.memory_space<vmem>>, vector<1x1x128xf32>
    %60 = vector.shape_cast %59 : vector<1x1x128xf32> to vector<1x128xf32>
    %61 = vector.broadcast %60 : vector<1x128xf32> to vector<32x128xf32>
    %62 = arith.addf %58, %61 : vector<32x128xf32>
    %cst_58 = arith.constant 0.000000e+00 : f32
    %63 = vector.broadcast %cst_58 : f32 to vector<32x128xf32>
    %64 = arith.maximumf %62, %63 : vector<32x128xf32>
    %65 = arith.addf %45, %64 : vector<32x128xf32>
    %66 = vector.shape_cast %64 : vector<32x128xf32> to vector<2x16x128xf32>
    %c0_59 = arith.constant 0 : index
    %c8_60 = arith.constant 8 : index
    %c0_61 = arith.constant 0 : index
    %67 = vector.load %arg5[%c0_59, %c8_60, %c0_61] : memref<2x32x128xf32, #tpu.memory_space<vmem>>, vector<2x16x128xf32>
    tpu.vector_store %arg5[%c0_59, %c8_60, %c0_61], %66 {strides = array<i32>} : memref<2x32x128xf32, #tpu.memory_space<vmem>>, vector<2x16x128xf32>,
    %c0_62 = arith.constant 0 : index
    %c0_63 = arith.constant 0 : index
    %c0_64 = arith.constant 0 : index
    %68 = vector.load %arg5[%c0_62, %c0_63, %c0_64] : memref<2x32x128xf32, #tpu.memory_space<vmem>>, vector<2x16x128xf32>
    %69 = vector.shape_cast %68 : vector<2x16x128xf32> to vector<32x128xf32>
    %c0_65 = arith.constant 0 : index
    %c8_66 = arith.constant 8 : index
    %c0_67 = arith.constant 0 : index
    %70 = vector.load %arg5[%c0_65, %c8_66, %c0_67] : memref<2x32x128xf32, #tpu.memory_space<vmem>>, vector<2x16x128xf32>
    %71 = vector.shape_cast %70 : vector<2x16x128xf32> to vector<32x128xf32>
    %c0_68 = arith.constant 0 : index
    %c16 = arith.constant 16 : index
    %c0_69 = arith.constant 0 : index
    %72 = vector.load %arg5[%c0_68, %c16, %c0_69] : memref<2x32x128xf32, #tpu.memory_space<vmem>>, vector<2x16x128xf32>
    %73 = vector.shape_cast %72 : vector<2x16x128xf32> to vector<32x128xf32>
    %74 = tpu.concatenate %69, %71, %73 in 1 : vector<32x128xf32>, vector<32x128xf32>, vector<32x128xf32> -> vector<32x384xf32>
    %75 = arith.truncf %74 : vector<32x384xf32> to vector<32x384xbf16>
    %c3 = arith.constant 3 : index
    %c0_70 = arith.constant 0 : index
    %c0_71 = arith.constant 0 : index
    %76 = vector.load %arg2[%c3, %c0_70, %c0_71] : memref<4x384x128xbf16, #tpu.memory_space<vmem>>, vector<1x384x128xbf16>
    %77 = vector.shape_cast %76 : vector<1x384x128xbf16> to vector<384x128xbf16>
    %cst_72 = arith.constant dense<0.000000e+00> : vector<32x128xf32>
    %78 = tpu.matmul %75, %77, %cst_72 {dimension_numbers = #tpu.dot_dimension_numbers<[1], [0], [0], [1], [0, 0, 1, 1], [], []>} : vector<32x384xbf16>, vector<384x128xbf16>, vector<32x128xf32> -> vector<32x128xf32>
    %c3_73 = arith.constant 3 : index
    %c0_74 = arith.constant 0 : index
    %c0_75 = arith.constant 0 : index
    %79 = vector.load %arg3[%c3_73, %c0_74, %c0_75] : memref<4x1x128xf32, #tpu.memory_space<vmem>>, vector<1x1x128xf32>
    %80 = vector.shape_cast %79 : vector<1x1x128xf32> to vector<1x128xf32>
    %81 = vector.broadcast %80 : vector<1x128xf32> to vector<32x128xf32>
    %82 = arith.addf %78, %81 : vector<32x128xf32>
    %cst_76 = arith.constant 0.000000e+00 : f32
    %83 = vector.broadcast %cst_76 : f32 to vector<32x128xf32>
    %84 = arith.maximumf %82, %83 : vector<32x128xf32>
    %85 = arith.addf %65, %84 : vector<32x128xf32>
    %c0_77 = arith.constant 0 : index
    %c0_78 = arith.constant 0 : index
    %86 = vector.load %arg4[%c0_77, %c0_78] : memref<32x128xf32, #tpu.memory_space<vmem>>, vector<32x128xf32>
    tpu.vector_store %arg4[%c0_77, %c0_78], %85 {strides = array<i32>} : memref<32x128xf32, #tpu.memory_space<vmem>>, vector<32x128xf32>,
    return
  }
  func.func @transform_0(%arg0: i32) -> (i32, i32) {
    %c0_i32 = arith.constant 0 : i32
    %c0_i32_0 = arith.constant 0 : i32
    return %arg0, %c0_i32 : i32, i32
  }
  func.func @transform_1(%arg0: i32) -> (i32, i32, i32) {
    %c0_i32 = arith.constant 0 : i32
    %c0_i32_0 = arith.constant 0 : i32
    %c0_i32_1 = arith.constant 0 : i32
    %c0_i32_2 = arith.constant 0 : i32
    return %c0_i32, %c0_i32_0, %c0_i32_1 : i32, i32, i32
  }
  func.func @transform_2(%arg0: i32) -> (i32, i32, i32) {
    %c0_i32 = arith.constant 0 : i32
    %c0_i32_0 = arith.constant 0 : i32
    %c0_i32_1 = arith.constant 0 : i32
    %c0_i32_2 = arith.constant 0 : i32
    return %c0_i32, %c0_i32_0, %c0_i32_1 : i32, i32, i32
  }
  func.func @transform_3(%arg0: i32) -> (i32, i32) {
    %c0_i32 = arith.constant 0 : i32
    %c0_i32_0 = arith.constant 0 : i32
    return %arg0, %c0_i32 : i32, i32
  }
}

</mosaic_0001>

<bundles_post_ra>
// kernel: tpu_custom_call.1
= control target key start
LH: loop header
LB: loop body
LE: loop exit
PB: predicated region body
PF: predicated region fallthrough
CT: control target
= control target key end

     0   :  { %8 = vsyncpa [#allocation4], 0  ;;  %s2012_s0 = inlined_call_operand.hbm [shape: f32[32,128], index: 0, kind: input, shape index: {}]   ;;  %s2013_s1 = inlined_call_operand.hbm [shape: bf16[4,384,128], index: 1, kind: input, shape index: {}]   ;;  %s2014_s2 = inlined_call_operand.hbm [shape: f32[4,1,128], index: 2, kind: input, shape index: {}]   ;;  %s2015_s3 = inlined_call_operand.hbm [shape: f32[32,128], index: 3, kind: output, shape index: {}]  }
   0x1   :  { %9 = vsyncpa [#allocation7], 0 }
   0x2   :  { %10 = vsyncpa [#allocation5], 0  ;;  %s1923_s12 = smov [#allocation6]  }
   0x3   :  { %s28_s13 = sshll.u32 %s1923_s12, 4  ;;  %s29_s13 = int_to_ptr.vmem [resolvable:$true] %s28_s13 }
   0x4   :  { %s1845_s14 = scalar_lea.vmem %s29_s13, 12288  ;;  %p1850_p1 = scmp.lt.s32.totalorder %s29_s13, %s29_s13 }
   0x5   :  { %p1846_p0 = scmp.ne.s32.totalorder %s29_s13, %s1845_s14  ;;  %p1851_p2 = scmp.lt.s32.totalorder %s1845_s14, %s1845_s14 }
   0x7   :  { %p1852_p3 = por %p1851_p2, %p1850_p1 }
   0x9   :  { %p1853_p4 = pnand %p1852_p3, %p1846_p0 }
   0xb   :  { %1856 = shalt.err (!%p1853_p4)
}
   0xc   :  { %s1924_s15 = smov 64   ;;  %s1925_s16 = smov 4  }
   0xd   :  { %34 = dma.hbm_to_vmem [thread:$0]  %s2013_s1, 12288, %s29_s13, [#allocation7], %s1924_s15, %s1924_s15, %s1925_s16  }
   0xe   :  { %s1926_s19 = smov [#allocation3]  }
   0xf   :  { %s16_s20 = sshll.u32 %s1926_s19, 4  ;;  %s17_s20 = int_to_ptr.vmem [resolvable:$true] %s16_s20 }
  0x10   :  { %s1865_s21 = scalar_lea.vmem %s17_s20, 512  ;;  %p1870_p6 = scmp.lt.s32.totalorder %s17_s20, %s17_s20 }
  0x11   :  { %p1866_p5 = scmp.ne.s32.totalorder %s17_s20, %s1865_s21  ;;  %p1871_p7 = scmp.lt.s32.totalorder %s1865_s21, %s1865_s21 }
  0x13   :  { %p1872_p8 = por %p1871_p7, %p1870_p6 }
  0x15   :  { %p1873_p9 = pnand %p1872_p8, %p1866_p5 }
  0x17   :  { %1876 = shalt.err (!%p1873_p9)
}
  0x18   :  { %s1927_s22 = smov 128   ;;  %s1928_s23 = smov 8  }
  0x19   :  { %22 = dma.hbm_to_vmem [thread:$0]  %s2012_s0, 512, %s17_s20, [#allocation4], %s1927_s22, %s1927_s22, %s1928_s23  }
  0x1a   :  { %s1929_s1 = smov [#allocation8]  }
  0x1b   :  { %s40_s26 = sshll.u32 %s1929_s1, 4  ;;  %s41_s26 = int_to_ptr.vmem [resolvable:$true] %s40_s26 }
  0x1c   :  { %s1885_s27 = scalar_lea.vmem %s41_s26, 64  ;;  %p1890_p11 = scmp.lt.s32.totalorder %s41_s26, %s41_s26 }
  0x1d   :  { %p1886_p10 = scmp.ne.s32.totalorder %s41_s26, %s1885_s27  ;;  %p1891_p12 = scmp.lt.s32.totalorder %s1885_s27, %s1885_s27 }
  0x1f   :  { %p1892_p13 = por %p1891_p12, %p1890_p11 }
  0x21   :  { %p1893_p0 = pnand %p1892_p13, %p1886_p10 }
  0x23   :  { %1896 = shalt.err (!%p1893_p0)
}
  0x24   :  { %s1930_s28 = smov 16   ;;  %s1931_s29 = smov 1  }
  0x25   :  { %46 = dma.hbm_to_vmem [thread:$0]  %s2014_s2, 64, %s41_s26, [#allocation7], %s1930_s28, %s1930_s28, %s1931_s29  }
  0x26   :  { %1917 = dma.done.wait [#allocation4], 512  }
  0x27   :  { %1918 = vsyncadd [#allocation4], 4294966784 }
  0x28   :  { %1919 = dma.done.wait [#allocation7], 12352  }
  0x29   :  { %1920 = vsyncadd [#allocation7], 4294954944  ;;  %v1932_v0 = vmov 0.0   ;;  %v1740_v1 = vld [vmem:[#allocation6 + $0x78] sm:$0xff]   ;;  %v1743_v4 = vld [vmem:[#allocation6 + $0x70] sm:$0xff]   ;;  %s1933_s0 = smov [#allocation9]  }
  0x2a   :  { %59 = vst [vmem:[#allocation2 + $0x18] sm:$0xff] %v1932_v0  ;;  %57 = vst [vmem:[#allocation2] sm:$0xff] %v1932_v0  ;;  %v1741_v2 = vld [vmem:[#allocation6 + $0xb8] sm:$0xff]   ;;  %1497 = vmatprep.subr.bf16.mxu0 %v1740_v1  ;;  %v1744_v5 = vld [vmem:[#allocation6 + $0xb0] sm:$0xff]   ;;  %s1384_s2 = sshll.u32 %s1933_s0, 4  ;;  %s1385_s2 = int_to_ptr.vmem [resolvable:$true] %s1384_s2 }
  0x2b   :  { %58 = vst [vmem:[#allocation2 + $0x20] sm:$0xff] %v1932_v0  ;;  %60 = vst [vmem:[#allocation2 + $0x38] sm:$0xff] %v1932_v0  ;;  %v1742_v3 = vld [vmem:[#allocation6 + $0x38] sm:$0xff]   ;;  %1649 = vmatprep.subr.bf16.mxu1 %v1741_v2  ;;  %v1745_v6 = vld [vmem:[#allocation6 + $0x30] sm:$0xff]   ;;  %s1897_s5 = scalar_lea.vmem %s1385_s2, 512  ;;  %p1902_p2 = scmp.lt.s32.totalorder %s1385_s2, %s1385_s2 }
  0x2c   :  { %1498 = vmatpush3.bf16.msra.mxu0 %v1742_v3  ;;  %1650 = vmatpush3.bf16.msra.mxu1 %v1741_v2  ;;  %v1746_v7 = vld [vmem:[#allocation6 + $0x68] sm:$0xff]   ;;  %v1749_v10 = vld [vmem:[#allocation6 + $0x60] sm:$0xff]   ;;  %v1752_v13 = vld [vmem:[#allocation6 + $0x58] sm:$0xff]   ;;  %p1898_p1 = scmp.ne.s32.totalorder %s1385_s2, %s1897_s5  ;;  %p1903_p3 = scmp.lt.s32.totalorder %s1897_s5, %s1897_s5 }
  0x2d   :  { %1499 = vmatprep.subr.bf16.mxu0 %v1743_v4  ;;  %1651 = vmatprep.subr.bf16.mxu1 %v1744_v5  ;;  %v1747_v8 = vld [vmem:[#allocation6 + $0xa8] sm:$0xff]   ;;  %v1750_v11 = vld [vmem:[#allocation6 + $0xa0] sm:$0xff]   ;;  %v1753_v14 = vld [vmem:[#allocation6 + $0x98] sm:$0xff]  }
  0x2e   :  { %v1748_v9 = vld [vmem:[#allocation6 + $0x28] sm:$0xff]   ;;  %v1751_v12 = vld [vmem:[#allocation6 + $0x20] sm:$0xff]   ;;  %v1754_v15 = vld [vmem:[#allocation6 + $0x18] sm:$0xff]   ;;  %p1904_p4 = por %p1903_p3, %p1902_p2 }
  0x2f   :  { %v1755_v16 = vld [vmem:[#allocation6 + $0x50] sm:$0xff]   ;;  %v1758_v19 = vld [vmem:[#allocation6 + $0x48] sm:$0xff]   ;;  %v1761_v22 = vld [vmem:[#allocation6 + $0x40] sm:$0xff]  }
  0x30   :  { %1500 = vmatpush3.bf16.msra.mxu0 %v1745_v6  ;;  %1652 = vmatpush3.bf16.msra.mxu1 %v1744_v5  ;;  %v1756_v17 = vld [vmem:[#allocation6 + $0x90] sm:$0xff]   ;;  %v1759_v20 = vld [vmem:[#allocation6 + $0x88] sm:$0xff]   ;;  %v1762_v23 = vld [vmem:[#allocation6 + $0x80] sm:$0xff]   ;;  %p1905_p5 = pnand %p1904_p4, %p1898_p1 }
  0x31   :  { %1501 = vmatprep.subr.bf16.mxu0 %v1746_v7  ;;  %1653 = vmatprep.subr.bf16.mxu1 %v1747_v8  ;;  %v1757_v18 = vld [vmem:[#allocation6 + $0x10] sm:$0xff]   ;;  %v1760_v21 = vld [vmem:[#allocation6 + $0x8] sm:$0xff]   ;;  %v61_v24 = vld [vmem:[#allocation3] sm:$0xff] }
  0x32   :  { %v62_v25 = vld [vmem:[#allocation3 + $0x8] sm:$0xff]  ;;  %v63_v26 = vld [vmem:[#allocation3 + $0x10] sm:$0xff]  ;;  %65 = vst [vmem:[#allocation2 + $0x8] sm:$0xff] %v61_v24  ;;  %v64_v28 = vld [vmem:[#allocation3 + $0x18] sm:$0xff] }
  0x33   :  { %66 = vst [vmem:[#allocation2 + $0x10] sm:$0xff] %v62_v25  ;;  %v82_v27 = vpack.c.bf16 %v62_v25, %v61_v24  ;;  %67 = vst [vmem:[#allocation2 + $0x28] sm:$0xff] %v63_v26  ;;  %v1763_v29 = vld [vmem:[#allocation6] sm:$0xff]   ;;  %v1764_v30 = vld [vmem:[#allocation6 + $0x138] sm:$0xff]   ;;  %v85_v39 = vpack.c.bf16 %v64_v28, %v63_v26 }
  0x34   :  { %1502 = vmatpush3.bf16.msra.mxu0 %v1748_v9  ;;  %1654 = vmatpush3.bf16.msra.mxu1 %v1747_v8  ;;  %68 = vst [vmem:[#allocation2 + $0x30] sm:$0xff] %v64_v28  ;;  %v1765_v31 = vld [vmem:[#allocation6 + $0xf8] sm:$0xff]   ;;  %v1766_v42 = vld [vmem:[#allocation6 + $0x130] sm:$0xff]   ;;  %v1769_v48 = vld [vmem:[#allocation6 + $0x128] sm:$0xff]  }
  0x35   :  { %1503 = vmatprep.subr.bf16.mxu0 %v1749_v10  ;;  %1655 = vmatprep.subr.bf16.mxu1 %v1750_v11  ;;  %v1767_v45 = vld [vmem:[#allocation6 + $0xf0] sm:$0xff]   ;;  %v1768_v47 = vld [vmem:[#allocation6 + $0x178] sm:$0xff]   ;;  %v1770_v49 = vld [vmem:[#allocation6 + $0xe8] sm:$0xff]  }
  0x36   :  { %318 = vmatprep.mubr.bf16.mxu0 %v82_v27  ;;  %v1771_v50 = vld [vmem:[#allocation6 + $0x170] sm:$0xff]   ;;  %v1772_v51 = vld [vmem:[#allocation6 + $0x120] sm:$0xff]   ;;  %v1774_v53 = vld [vmem:[#allocation6 + $0x168] sm:$0xff]  }
  0x37   :  { %v1773_v52 = vld [vmem:[#allocation6 + $0xe0] sm:$0xff]   ;;  %v1775_v54 = vld [vmem:[#allocation6 + $0x118] sm:$0xff]   ;;  %v1778_v57 = vld [vmem:[#allocation6 + $0x110] sm:$0xff]  }
  0x38   :  { %1504 = vmatpush3.bf16.msra.mxu0 %v1751_v12  ;;  %1656 = vmatpush3.bf16.msra.mxu1 %v1750_v11  ;;  %v1776_v55 = vld [vmem:[#allocation6 + $0xd8] sm:$0xff]   ;;  %v1777_v56 = vld [vmem:[#allocation6 + $0x160] sm:$0xff]   ;;  %v1779_v58 = vld [vmem:[#allocation6 + $0xd0] sm:$0xff]  }
  0x39   :  { %1505 = vmatprep.subr.bf16.mxu0 %v1752_v13  ;;  %1657 = vmatprep.subr.bf16.mxu1 %v1753_v14  ;;  %v69_v34 = vld [vmem:[#allocation2 + $0x7] sm:$0xff]  ;;  %v1780_v59 = vld [vmem:[#allocation6 + $0x158] sm:$0xff]   ;;  %v1783_v62 = vld [vmem:[#allocation6 + $0x150] sm:$0xff]  }
  0x3a   :  { %v77_v32 = vld [vmem:[#allocation2 + $0x9] sm:$0xff]  ;;  %v78_v33 = vld [vmem:[#allocation2 + $0x11] sm:$0xff]  ;;  %v1784_v63 = vld [vmem:[#allocation6 + $0x100] sm:$0xff]  }
  0x3b   :  { %v83_v35 = vpack.c.bf16 %v78_v33, %v77_v32  ;;  %v70_v36 = vld [vmem:[#allocation2 + $0xf] sm:$0xff]  ;;  %v71_v43 = vld [vmem:[#allocation2 + $0x27] sm:$0xff]  ;;  %v1788_v3 = vld [vmem:[#allocation6 + $0x1f8] sm:$0xff]  }
  0x3c   :  { %1506 = vmatpush3.bf16.msra.mxu0 %v1754_v15  ;;  %1658 = vmatpush3.bf16.msra.mxu1 %v1753_v14  ;;  %v79_v37 = vld [vmem:[#allocation2 + $0x29] sm:$0xff]  ;;  %v80_v38 = vld [vmem:[#allocation2 + $0x31] sm:$0xff]  ;;  %v81_v40 = vpack.c.bf16 %v70_v36, %v69_v34  ;;  %v1785_v0 = vld [vmem:[#allocation6 + $0xc0] sm:$0xff]  }
  0x3d   :  { %1507 = vmatprep.subr.bf16.mxu0 %v1755_v16  ;;  %1659 = vmatprep.subr.bf16.mxu1 %v1756_v17  ;;  %v86_v41 = vpack.c.bf16 %v80_v38, %v79_v37  ;;  %v72_v44 = vld [vmem:[#allocation2 + $0x2f] sm:$0xff]  ;;  %v1787_v2 = vld [vmem:[#allocation6 + $0x140] sm:$0xff]  }
  0x3e   :  { %1665 = vmatprep.mubr.bf16.mxu1 %v83_v35  ;;  %v84_v46 = vpack.c.bf16 %v72_v44, %v71_v43  ;;  %v1781_v60 = vld [vmem:[#allocation6 + $0x108] sm:$0xff]   ;;  %v1397_v7 = vld [vmem:[#allocation8] ss:$0 sm:$0xff]  ;;  %v1789_v35 = vld [vmem:[#allocation6 + $0x1b8] sm:$0xff]  }
  0x3f   :  { %v1782_v61 = vld [vmem:[#allocation6 + $0xc8] sm:$0xff]  }
  0x40   :  { %1508 = vmatpush3.bf16.msra.mxu0 %v1757_v18  ;;  %1660 = vmatpush3.bf16.msra.mxu1 %v1756_v17  ;;  %v1786_v1 = vld [vmem:[#allocation6 + $0x148] sm:$0xff]  }
  0x41   :  { %1509 = vmatprep.subr.bf16.mxu0 %v1758_v19  ;;  %1661 = vmatprep.subr.bf16.mxu1 %v1759_v20 }
  0x44   :  { %1510 = vmatpush3.bf16.msra.mxu0 %v1760_v21  ;;  %1662 = vmatpush3.bf16.msra.mxu1 %v1759_v20 }
  0x45   :  { %1511 = vmatprep.subr.bf16.mxu0 %v1761_v22  ;;  %1663 = vmatprep.subr.bf16.mxu1 %v1762_v23 }
  0x48   :  { %1512 = vmatpush3.bf16.msra.mxu0 %v1763_v29  ;;  %1664 = vmatpush3.bf16.msra.mxu1 %v1762_v23 }
  0x49   :  { %1535 = vmatprep.subr.bf16.mxu0 %v1764_v30  ;;  %1669 = vmatprep.subr.bf16.mxu1 %v1768_v47 }
  0x4b   :  { %319 = vmatmul.mubr.bf16.vlgmr.msra.gmra.mxu0 %v81_v40  ;;  %1666 = vmatmul.mubr.bf16.vlgmr.msra.gmra.mxu1 %v86_v41 }
  0x4c   :  { %326 = vmatprep.mubr.bf16.mxu0 %v85_v39  ;;  %1536 = vmatpush3.bf16.msra.mxu0 %v1765_v31 }
  0x4d   :  { %1537 = vmatprep.subr.bf16.mxu0 %v1766_v42  ;;  %1670 = vmatpush3.bf16.msra.mxu1 %v1768_v47 }
  0x4e   :  { %1671 = vmatprep.subr.bf16.mxu1 %v1771_v50 }
  0x50   :  { %1538 = vmatpush3.bf16.msra.mxu0 %v1767_v45 }
  0x51   :  { %1539 = vmatprep.subr.bf16.mxu0 %v1769_v48  ;;  %1672 = vmatpush3.bf16.msra.mxu1 %v1771_v50  ;;  %v1790_v48 = vld [vmem:[#allocation6 + $0x1f0] sm:$0xff]  }
  0x52   :  { %1673 = vmatprep.subr.bf16.mxu1 %v1774_v53  ;;  %v1792_v50 = vld [vmem:[#allocation6 + $0x1b0] sm:$0xff]  }
  0x53   :  { %327 = vmatmul.mubr.bf16.gmra.mxu0 %v84_v46 }
  0x54   :  { %1540 = vmatpush3.bf16.msra.mxu0 %v1770_v49  ;;  %v1791_v49 = vld [vmem:[#allocation6 + $0x238] sm:$0xff]  }
  0x55   :  { %1541 = vmatprep.subr.bf16.mxu0 %v1772_v51  ;;  %1674 = vmatpush3.bf16.msra.mxu1 %v1774_v53  ;;  %v1793_v51 = vld [vmem:[#allocation6 + $0x1e8] sm:$0xff]  }
  0x56   :  { %1675 = vmatprep.subr.bf16.mxu1 %v1777_v56  ;;  %v1795_v53 = vld [vmem:[#allocation6 + $0x1a8] sm:$0xff]  }
  0x58   :  { %1542 = vmatpush3.bf16.msra.mxu0 %v1773_v52  ;;  %v1794_v52 = vld [vmem:[#allocation6 + $0x230] sm:$0xff]  }
  0x59   :  { %1543 = vmatprep.subr.bf16.mxu0 %v1775_v54  ;;  %1676 = vmatpush3.bf16.msra.mxu1 %v1777_v56  ;;  %v1796_v54 = vld [vmem:[#allocation6 + $0x1e0] sm:$0xff]  }
  0x5a   :  { %1677 = vmatprep.subr.bf16.mxu1 %v1780_v59  ;;  %v1798_v56 = vld [vmem:[#allocation6 + $0x1a0] sm:$0xff]  }
  0x5c   :  { %1544 = vmatpush3.bf16.msra.mxu0 %v1776_v55  ;;  %v1797_v55 = vld [vmem:[#allocation6 + $0x228] sm:$0xff]  }
  0x5d   :  { %1545 = vmatprep.subr.bf16.mxu0 %v1778_v57  ;;  %1678 = vmatpush3.bf16.msra.mxu1 %v1780_v59  ;;  %v1799_v57 = vld [vmem:[#allocation6 + $0x1d8] sm:$0xff]  }
  0x5e   :  { %1679 = vmatprep.subr.bf16.mxu1 %v1783_v62  ;;  %v1801_v59 = vld [vmem:[#allocation6 + $0x198] sm:$0xff]  }
  0x60   :  { %1546 = vmatpush3.bf16.msra.mxu0 %v1779_v58  ;;  %v1800_v58 = vld [vmem:[#allocation6 + $0x220] sm:$0xff]  }
  0x61   :  { %1547 = vmatprep.subr.bf16.mxu0 %v1781_v60  ;;  %1680 = vmatpush3.bf16.msra.mxu1 %v1783_v62  ;;  %v1802_v60 = vld [vmem:[#allocation6 + $0x1d0] sm:$0xff]  }
  0x62   :  { %1681 = vmatprep.subr.bf16.mxu1 %v1786_v1  ;;  %v1804_v62 = vld [vmem:[#allocation6 + $0x190] sm:$0xff]  }
  0x64   :  { %1548 = vmatpush3.bf16.msra.mxu0 %v1782_v61  ;;  %v1803_v61 = vld [vmem:[#allocation6 + $0x218] sm:$0xff]  }
  0x65   :  { %1549 = vmatprep.subr.bf16.mxu0 %v1784_v63  ;;  %1682 = vmatpush3.bf16.msra.mxu1 %v1786_v1  ;;  %v1805_v63 = vld [vmem:[#allocation6 + $0x1c8] sm:$0xff]  }
  0x66   :  { %1683 = vmatprep.subr.bf16.mxu1 %v1787_v2  ;;  %v1807_v1 = vld [vmem:[#allocation6 + $0x188] sm:$0xff]  }
  0x68   :  { %1550 = vmatpush3.bf16.msra.mxu0 %v1785_v0  ;;  %v1806_v0 = vld [vmem:[#allocation6 + $0x210] sm:$0xff]  }
  0x69   :  { %1684 = vmatpush3.bf16.msra.mxu1 %v1787_v2  ;;  %1573 = vmatprep.subr.bf16.mxu0 %v1788_v3  ;;  %v1808_v2 = vld [vmem:[#allocation6 + $0x1c0] sm:$0xff]   ;;  %v1809_v3 = vld [vmem:[#allocation6 + $0x208] sm:$0xff]  }
  0x6a   :  { %1689 = vmatprep.subr.bf16.mxu1 %v1791_v49 }
 0x10b   :  { %v1513_v4 = vpop.f32.mrf.mxu0  ;;  %v1667_v5 = vpop.f32.mrf.mxu1 }
 0x10d   :  { %v1514_v6 = vpop.f32.mrf.mxu0  ;;  %v369_v8 = vpop.f32.mrf.mxu1 }
 0x10e   :  { %v1515_v9 = vadd.f32 %v1514_v6, %v1513_v4  ;;  %v1810_v4 = vld [vmem:[#allocation6 + $0x180] sm:$0xff]   ;;  %v1812_v6 = vld [vmem:[#allocation6 + $0x2b8] sm:$0xff]  }
 0x10f   :  { %v1516_v10 = vpop.f32.mrf.mxu0  ;;  %v1668_v12 = vpop.f32.mrf.mxu1 }
 0x110   :  { %v321_v11 = vadd.f32 %v1515_v9, %v1397_v7 }
 0x111   :  { %v1517_v13 = vpop.f32.mrf.mxu0  ;;  %v372_v19 = vpop.f32.mrf.mxu1 }
 0x112   :  { %v370_v14 = vadd.f32 %v369_v8, %v321_v11  ;;  %v1518_v15 = vadd.f32 %v1517_v13, %v1516_v10 }
 0x113   :  { %v1519_v16 = vpop.f32.mrf.mxu0 }
 0x114   :  { %v1966_v17 = vmax.f32 %v370_v14, 0.0  ;;  %v324_v18 = vadd.f32 %v1518_v15, %v1397_v7 }
 0x115   :  { %v1520_v20 = vpop.f32.mrf.mxu0 }
 0x116   :  { %392 = vst [vmem:[#allocation2 + $0x8] sm:$0xff] %v1966_v17  ;;  %v373_v21 = vadd.f32 %v372_v19, %v324_v18  ;;  %v1521_v22 = vadd.f32 %v1520_v20, %v1519_v16 }
 0x117   :  { %v1522_v23 = vpop.f32.mrf.mxu0 }
 0x118   :  { %v1969_v24 = vmax.f32 %v373_v21, 0.0  ;;  %v329_v25 = vadd.f32 %v1521_v22, %v1397_v7 }
 0x119   :  { %v1523_v26 = vpop.f32.mrf.mxu0 }
 0x11a   :  { %393 = vst [vmem:[#allocation2 + $0x10] sm:$0xff] %v1969_v24  ;;  %v378_v27 = vadd.f32 %v1667_v5, %v329_v25  ;;  %v1524_v28 = vadd.f32 %v1523_v26, %v1522_v23  ;;  %v409_v29 = vpack.c.bf16 %v1969_v24, %v1966_v17  ;;  %v1811_v5 = vld [vmem:[#allocation6 + $0x200] sm:$0xff]  }
 0x11c   :  { %v1974_v30 = vmax.f32 %v378_v27, 0.0  ;;  %v332_v31 = vadd.f32 %v1524_v28, %v1397_v7  ;;  %647 = vmatprep.mubr.bf16.mxu0 %v409_v29 }
 0x11d   :  { %v396_v34 = vld [vmem:[#allocation2 + $0x6] sm:$0xff] }
 0x11e   :  { %394 = vst [vmem:[#allocation2 + $0x28] sm:$0xff] %v1974_v30  ;;  %v381_v32 = vadd.f32 %v1668_v12, %v332_v31  ;;  %v1422_v12 = vld [vmem:[#allocation8 + $0x1] ss:$0 sm:$0xff] }
 0x120   :  { %v1977_v33 = vmax.f32 %v381_v32, 0.0 }
 0x121   :  { %v404_v36 = vld [vmem:[#allocation2 + $0xa] sm:$0xff]  ;;  %v405_v37 = vld [vmem:[#allocation2 + $0x12] sm:$0xff] }
 0x122   :  { %v397_v38 = vld [vmem:[#allocation2 + $0xe] sm:$0xff]  ;;  %395 = vst [vmem:[#allocation2 + $0x30] sm:$0xff] %v1977_v33  ;;  %v410_v39 = vpack.c.bf16 %v405_v37, %v404_v36  ;;  %v412_v41 = vpack.c.bf16 %v1977_v33, %v1974_v30 }
 0x123   :  { %v408_v40 = vpack.c.bf16 %v397_v38, %v396_v34 }
 0x124   :  { %1685 = vmatprep.mubr.bf16.mxu1 %v410_v39 }
 0x125   :  { %648 = vmatmul.mubr.bf16.vlgmr.msra.gmra.mxu0 %v408_v40  ;;  %v398_v42 = vld [vmem:[#allocation2 + $0x26] sm:$0xff] }
 0x126   :  { %655 = vmatprep.mubr.bf16.mxu0 %v412_v41  ;;  %1574 = vmatpush3.bf16.msra.mxu0 %v1789_v35  ;;  %v1813_v41 = vld [vmem:[#allocation6 + $0x278] sm:$0xff]  }
 0x127   :  { %1575 = vmatprep.subr.bf16.mxu0 %v1790_v48 }
 0x129   :  { %v406_v43 = vld [vmem:[#allocation2 + $0x2a] sm:$0xff]  ;;  %v407_v44 = vld [vmem:[#allocation2 + $0x32] sm:$0xff] }
 0x12a   :  { %v399_v45 = vld [vmem:[#allocation2 + $0x2e] sm:$0xff]  ;;  %v413_v46 = vpack.c.bf16 %v407_v44, %v406_v43  ;;  %1576 = vmatpush3.bf16.msra.mxu0 %v1792_v50 }
 0x12b   :  { %v411_v47 = vpack.c.bf16 %v399_v45, %v398_v42  ;;  %1577 = vmatprep.subr.bf16.mxu0 %v1793_v51  ;;  %v1815_v51 = vld [vmem:[#allocation6 + $0x270] sm:$0xff]  }
 0x12c   :  { %1686 = vmatmul.mubr.bf16.vlgmr.msra.gmra.mxu1 %v413_v46 }
 0x12d   :  { %656 = vmatmul.mubr.bf16.gmra.mxu0 %v411_v47  ;;  %1690 = vmatpush3.bf16.msra.mxu1 %v1791_v49  ;;  %v1814_v47 = vld [vmem:[#allocation6 + $0x2b0] sm:$0xff]  }
 0x12e   :  { %1691 = vmatprep.subr.bf16.mxu1 %v1794_v52  ;;  %1578 = vmatpush3.bf16.msra.mxu0 %v1795_v53 }
 0x12f   :  { %1579 = vmatprep.subr.bf16.mxu0 %v1796_v54 }
 0x131   :  { %1692 = vmatpush3.bf16.msra.mxu1 %v1794_v52 }
 0x132   :  { %1693 = vmatprep.subr.bf16.mxu1 %v1797_v55  ;;  %1580 = vmatpush3.bf16.msra.mxu0 %v1798_v56  ;;  %v1817_v56 = vld [vmem:[#allocation6 + $0x2a8] sm:$0xff]  }
 0x133   :  { %1581 = vmatprep.subr.bf16.mxu0 %v1799_v57  ;;  %v1818_v57 = vld [vmem:[#allocation6 + $0x268] sm:$0xff]  }
 0x135   :  { %1694 = vmatpush3.bf16.msra.mxu1 %v1797_v55  ;;  %v1816_v55 = vld [vmem:[#allocation6 + $0x2f8] sm:$0xff]  }
 0x136   :  { %1695 = vmatprep.subr.bf16.mxu1 %v1800_v58  ;;  %1582 = vmatpush3.bf16.msra.mxu0 %v1801_v59  ;;  %v1820_v59 = vld [vmem:[#allocation6 + $0x2a0] sm:$0xff]  }
 0x137   :  { %1583 = vmatprep.subr.bf16.mxu0 %v1802_v60  ;;  %v1821_v60 = vld [vmem:[#allocation6 + $0x260] sm:$0xff]  }
 0x139   :  { %1696 = vmatpush3.bf16.msra.mxu1 %v1800_v58  ;;  %v1819_v58 = vld [vmem:[#allocation6 + $0x2f0] sm:$0xff]  }
 0x13a   :  { %1697 = vmatprep.subr.bf16.mxu1 %v1803_v61  ;;  %1584 = vmatpush3.bf16.msra.mxu0 %v1804_v62  ;;  %v1823_v62 = vld [vmem:[#allocation6 + $0x298] sm:$0xff]  }
 0x13b   :  { %1585 = vmatprep.subr.bf16.mxu0 %v1805_v63  ;;  %v1824_v63 = vld [vmem:[#allocation6 + $0x258] sm:$0xff]  }
 0x13d   :  { %1698 = vmatpush3.bf16.msra.mxu1 %v1803_v61  ;;  %v1822_v61 = vld [vmem:[#allocation6 + $0x2e8] sm:$0xff]  }
 0x13e   :  { %1699 = vmatprep.subr.bf16.mxu1 %v1806_v0  ;;  %1586 = vmatpush3.bf16.msra.mxu0 %v1807_v1  ;;  %v1826_v1 = vld [vmem:[#allocation6 + $0x290] sm:$0xff]  }
 0x13f   :  { %1587 = vmatprep.subr.bf16.mxu0 %v1808_v2  ;;  %v1827_v2 = vld [vmem:[#allocation6 + $0x250] sm:$0xff]  }
 0x141   :  { %1700 = vmatpush3.bf16.msra.mxu1 %v1806_v0  ;;  %v1825_v0 = vld [vmem:[#allocation6 + $0x2e0] sm:$0xff]  }
 0x142   :  { %1701 = vmatprep.subr.bf16.mxu1 %v1809_v3  ;;  %1588 = vmatpush3.bf16.msra.mxu0 %v1810_v4  ;;  %v1829_v4 = vld [vmem:[#allocation6 + $0x288] sm:$0xff]  }
 0x143   :  { %1611 = vmatprep.subr.bf16.mxu0 %v1812_v6  ;;  %v1831_v6 = vld [vmem:[#allocation6 + $0x2d0] sm:$0xff]  }
 0x145   :  { %1702 = vmatpush3.bf16.msra.mxu1 %v1809_v3  ;;  %v1828_v3 = vld [vmem:[#allocation6 + $0x2d8] sm:$0xff]  }
 0x146   :  { %1703 = vmatprep.subr.bf16.mxu1 %v1811_v5 }
 0x149   :  { %1704 = vmatpush3.bf16.msra.mxu1 %v1811_v5  ;;  %v1830_v5 = vld [vmem:[#allocation6 + $0x248] sm:$0xff]  }
 0x14a   :  { %1709 = vmatprep.subr.bf16.mxu1 %v1816_v55 }
 0x1e5   :  { %v1551_v7 = vpop.f32.mrf.mxu0 }
 0x1e7   :  { %v1552_v8 = vpop.f32.mrf.mxu0 }
 0x1e8   :  { %v1553_v10 = vadd.f32 %v1552_v8, %v1551_v7  ;;  %v1832_v7 = vld [vmem:[#allocation6 + $0x280] sm:$0xff]  }
 0x1e9   :  { %v1554_v9 = vpop.f32.mrf.mxu0  ;;  %v1833_v8 = vld [vmem:[#allocation6 + $0x240] sm:$0xff]  }
 0x1ea   :  { %v650_v16 = vadd.f32 %v1553_v10, %v1422_v12  ;;  %v1835_v10 = vld [vmem:[#allocation6 + $0x2c0] sm:$0xff]  }
 0x1eb   :  { %v1555_v11 = vpop.f32.mrf.mxu0 }
 0x1ec   :  { %v1687_v13 = vpop.f32.mrf.mxu1  ;;  %v1556_v15 = vadd.f32 %v1555_v11, %v1554_v9  ;;  %v1834_v9 = vld [vmem:[#allocation6 + $0x2c8] sm:$0xff]  }
 0x1ed   :  { %v1557_v14 = vpop.f32.mrf.mxu0 }
 0x1ee   :  { %v698_v18 = vpop.f32.mrf.mxu1  ;;  %v653_v27 = vadd.f32 %v1556_v15, %v1422_v12 }
 0x1ef   :  { %v1558_v19 = vpop.f32.mrf.mxu0  ;;  %v699_v20 = vadd.f32 %v698_v18, %v650_v16 }
 0x1f0   :  { %v1559_v21 = vadd.f32 %v1558_v19, %v1557_v14  ;;  %v1688_v22 = vpop.f32.mrf.mxu1 }
 0x1f1   :  { %v1560_v23 = vpop.f32.mrf.mxu0  ;;  %v1982_v25 = vmax.f32 %v699_v20, 0.0 }
 0x1f2   :  { %v658_v26 = vadd.f32 %v1559_v21, %v1422_v12  ;;  %v701_v28 = vpop.f32.mrf.mxu1 }
 0x1f3   :  { %v1561_v29 = vpop.f32.mrf.mxu0  ;;  %721 = vst [vmem:[#allocation2 + $0x8] sm:$0xff] %v1982_v25  ;;  %v702_v32 = vadd.f32 %v701_v28, %v653_v27  ;;  %v717_v27 = vadd.f32 %v1982_v25, %v1966_v17 }
 0x1f4   :  { %v707_v31 = vadd.f32 %v1687_v13, %v658_v26  ;;  %v1562_v34 = vadd.f32 %v1561_v29, %v1560_v23  ;;  %v1447_v13 = vld [vmem:[#allocation8 + $0x2] ss:$0 sm:$0xff] }
 0x1f5   :  { %v1987_v36 = vmax.f32 %v702_v32, 0.0 }
 0x1f6   :  { %v1985_v35 = vmax.f32 %v707_v31, 0.0  ;;  %v661_v37 = vadd.f32 %v1562_v34, %v1422_v12 }
 0x1f7   :  { %722 = vst [vmem:[#allocation2 + $0x10] sm:$0xff] %v1987_v36  ;;  %v736_v39 = vpack.c.bf16 %v1987_v36, %v1982_v25  ;;  %v1836_v25 = vld [vmem:[#allocation2 + $0x18] sm:$0xff] }
 0x1f8   :  { %723 = vst [vmem:[#allocation2 + $0x28] sm:$0xff] %v1985_v35  ;;  %v710_v38 = vadd.f32 %v1688_v22, %v661_v37 }
 0x1f9   :  { %974 = vmatprep.mubr.bf16.mxu0 %v736_v39 }
 0x1fa   :  { %v1993_v40 = vmax.f32 %v710_v38, 0.0  ;;  %v725_v44 = vld [vmem:[#allocation2 + $0x4] sm:$0xff] }
 0x1fc   :  { %724 = vst [vmem:[#allocation2 + $0x30] sm:$0xff] %v1993_v40  ;;  %v739_v48 = vpack.c.bf16 %v1993_v40, %v1985_v35 }
 0x1fe   :  { %v726_v42 = vld [vmem:[#allocation2 + $0xc] sm:$0xff]  ;;  %v733_v43 = vld [vmem:[#allocation2 + $0x14] sm:$0xff] }
 0x1ff   :  { %v737_v45 = vpack.c.bf16 %v733_v43, %v726_v42  ;;  %v735_v46 = vpack.c.bf16 %v726_v42, %v725_v44  ;;  %v727_v53 = vld [vmem:[#allocation2 + $0x24] sm:$0xff] }
 0x201   :  { %1705 = vmatprep.mubr.bf16.mxu1 %v737_v45  ;;  %975 = vmatmul.mubr.bf16.vlgmr.msra.gmra.mxu0 %v735_v46 }
 0x202   :  { %982 = vmatprep.mubr.bf16.mxu0 %v739_v48  ;;  %1612 = vmatpush3.bf16.msra.mxu0 %v1813_v41  ;;  %v718_v41 = vadd.f32 %v1987_v36, %v1969_v24 }
 0x203   :  { %v728_v49 = vld [vmem:[#allocation2 + $0x2c] sm:$0xff]  ;;  %v734_v50 = vld [vmem:[#allocation2 + $0x34] sm:$0xff]  ;;  %1613 = vmatprep.subr.bf16.mxu0 %v1814_v47 }
 0x204   :  { %v740_v52 = vpack.c.bf16 %v734_v50, %v728_v49  ;;  %v738_v54 = vpack.c.bf16 %v728_v49, %v727_v53  ;;  %v719_v50 = vadd.f32 %v1985_v35, %v1974_v30  ;;  %v720_v53 = vadd.f32 %v1993_v40, %v1977_v33 }
 0x206   :  { %1706 = vmatmul.mubr.bf16.vlgmr.msra.gmra.mxu1 %v740_v52  ;;  %1614 = vmatpush3.bf16.msra.mxu0 %v1815_v51 }
 0x207   :  { %1615 = vmatprep.subr.bf16.mxu0 %v1817_v56  ;;  %1710 = vmatpush3.bf16.msra.mxu1 %v1816_v55 }
 0x208   :  { %1711 = vmatprep.subr.bf16.mxu1 %v1819_v58 }
 0x209   :  { %983 = vmatmul.mubr.bf16.gmra.mxu0 %v738_v54 }
 0x20a   :  { %1616 = vmatpush3.bf16.msra.mxu0 %v1818_v57 }
 0x20b   :  { %1617 = vmatprep.subr.bf16.mxu0 %v1820_v59  ;;  %1712 = vmatpush3.bf16.msra.mxu1 %v1819_v58 }
 0x20c   :  { %1713 = vmatprep.subr.bf16.mxu1 %v1822_v61 }
 0x20e   :  { %1618 = vmatpush3.bf16.msra.mxu0 %v1821_v60 }
 0x20f   :  { %1619 = vmatprep.subr.bf16.mxu0 %v1823_v62  ;;  %1714 = vmatpush3.bf16.msra.mxu1 %v1822_v61  ;;  %v1472_v61 = vld [vmem:[#allocation8 + $0x3] ss:$0 sm:$0xff] }
 0x210   :  { %1715 = vmatprep.subr.bf16.mxu1 %v1825_v0 }
 0x212   :  { %1620 = vmatpush3.bf16.msra.mxu0 %v1824_v63 }
 0x213   :  { %1621 = vmatprep.subr.bf16.mxu0 %v1826_v1  ;;  %1716 = vmatpush3.bf16.msra.mxu1 %v1825_v0 }
 0x214   :  { %1717 = vmatprep.subr.bf16.mxu1 %v1828_v3 }
 0x216   :  { %1622 = vmatpush3.bf16.msra.mxu0 %v1827_v2 }
 0x217   :  { %1623 = vmatprep.subr.bf16.mxu0 %v1829_v4  ;;  %1718 = vmatpush3.bf16.msra.mxu1 %v1828_v3 }
 0x218   :  { %1719 = vmatprep.subr.bf16.mxu1 %v1831_v6 }
 0x21a   :  { %1624 = vmatpush3.bf16.msra.mxu0 %v1830_v5 }
 0x21b   :  { %1625 = vmatprep.subr.bf16.mxu0 %v1832_v7  ;;  %1720 = vmatpush3.bf16.msra.mxu1 %v1831_v6 }
 0x21c   :  { %1721 = vmatprep.subr.bf16.mxu1 %v1834_v9 }
 0x21e   :  { %1626 = vmatpush3.bf16.msra.mxu0 %v1833_v8 }
 0x21f   :  { %1722 = vmatpush3.bf16.msra.mxu1 %v1834_v9 }
 0x220   :  { %1723 = vmatprep.subr.bf16.mxu1 %v1835_v10 }
 0x223   :  { %1724 = vmatpush3.bf16.msra.mxu1 %v1835_v10 }
 0x2c1   :  { %v1589_v11 = vpop.f32.mrf.mxu0 }
 0x2c3   :  { %v1590_v12 = vpop.f32.mrf.mxu0 }
 0x2c4   :  { %v1591_v14 = vadd.f32 %v1590_v12, %v1589_v11 }
 0x2c5   :  { %v1592_v15 = vpop.f32.mrf.mxu0 }
 0x2c6   :  { %v1707_v16 = vpop.f32.mrf.mxu1  ;;  %v977_v18 = vadd.f32 %v1591_v14, %v1447_v13 }
 0x2c7   :  { %v1593_v19 = vpop.f32.mrf.mxu0 }
 0x2c8   :  { %v1025_v20 = vpop.f32.mrf.mxu1  ;;  %v1594_v21 = vadd.f32 %v1593_v19, %v1592_v15 }
 0x2c9   :  { %v1026_v22 = vadd.f32 %v1025_v20, %v977_v18  ;;  %v1595_v23 = vpop.f32.mrf.mxu0 }
 0x2ca   :  { %v1708_v26 = vpop.f32.mrf.mxu1  ;;  %v980_v29 = vadd.f32 %v1594_v21, %v1447_v13 }
 0x2cb   :  { %v1040_v28 = vmax.f32 %v1026_v22, 0.0  ;;  %v1596_v31 = vpop.f32.mrf.mxu0 }
 0x2cc   :  { %v1028_v32 = vpop.f32.mrf.mxu1  ;;  %v1597_v37 = vadd.f32 %v1596_v31, %v1595_v23 }
 0x2cd   :  { %v1044_v34 = vadd.f32 %v1040_v28, %v717_v27  ;;  %1048 = vst [vmem:[#allocation2 + $0x8] sm:$0xff] %v1040_v28  ;;  %v1029_v38 = vadd.f32 %v1028_v32, %v980_v29  ;;  %v1598_v39 = vpop.f32.mrf.mxu0  ;;  %v1062_v48 = vpack.c.bf16 %v1040_v28, %v1836_v25 }
 0x2ce   :  { %v985_v42 = vadd.f32 %v1597_v37, %v1447_v13 }
 0x2cf   :  { %v1041_v43 = vmax.f32 %v1029_v38, 0.0  ;;  %v1599_v44 = vpop.f32.mrf.mxu0 }
 0x2d0   :  { %v1034_v45 = vadd.f32 %v1707_v16, %v985_v42  ;;  %v1600_v47 = vadd.f32 %v1599_v44, %v1598_v39 }
 0x2d1   :  { %v1045_v46 = vadd.f32 %v1041_v43, %v718_v41  ;;  %1049 = vst [vmem:[#allocation2 + $0x10] sm:$0xff] %v1041_v43  ;;  %v1063_v17 = vpack.c.bf16 %v1041_v43, %v1040_v28  ;;  %v1064_v49 = vpack.c.bf16 %v1836_v25, %v1041_v43 }
 0x2d2   :  { %v1042_v51 = vmax.f32 %v1034_v45, 0.0  ;;  %v988_v52 = vadd.f32 %v1600_v47, %v1447_v13 }
 0x2d3   :  { %1301 = vmatprep.mubr.bf16.mxu0 %v1063_v17  ;;  %1725 = vmatprep.mubr.bf16.mxu1 %v1064_v49 }
 0x2d4   :  { %1302 = vmatmul.mubr.bf16.vlgmr.msra.gmra.mxu0 %v1062_v48  ;;  %v1046_v24 = vadd.f32 %v1042_v51, %v719_v50  ;;  %1050 = vst [vmem:[#allocation2 + $0x28] sm:$0xff] %v1042_v51  ;;  %v1037_v36 = vadd.f32 %v1708_v26, %v988_v52  ;;  %v1065_v58 = vpack.c.bf16 %v1042_v51, %v1836_v25 }
 0x2d6   :  { %v1043_v54 = vmax.f32 %v1037_v36, 0.0 }
 0x2d8   :  { %v1047_v55 = vadd.f32 %v1043_v54, %v720_v53  ;;  %1051 = vst [vmem:[#allocation2 + $0x30] sm:$0xff] %v1043_v54  ;;  %v1066_v56 = vpack.c.bf16 %v1043_v54, %v1042_v51  ;;  %v1067_v57 = vpack.c.bf16 %v1836_v25, %v1043_v54 }
 0x2da   :  { %1309 = vmatprep.mubr.bf16.mxu0 %v1066_v56  ;;  %1726 = vmatmul.mubr.bf16.vlgmr.msra.gmra.mxu1 %v1067_v57 }
 0x2dc   :  { %1310 = vmatmul.mubr.bf16.gmra.mxu0 %v1065_v58 }
 0x394   :  { %v1627_v30 = vpop.f32.mrf.mxu0 }
 0x396   :  { %v1628_v35 = vpop.f32.mrf.mxu0 }
 0x397   :  { %v1629_v59 = vadd.f32 %v1628_v35, %v1627_v30 }
 0x398   :  { %v1630_v60 = vpop.f32.mrf.mxu0 }
 0x399   :  { %v1304_v2 = vadd.f32 %v1629_v59, %v1472_v61 }
 0x39a   :  { %v1631_v62 = vpop.f32.mrf.mxu0  ;;  %v1727_v63 = vpop.f32.mrf.mxu1 }
 0x39b   :  { %v1632_v0 = vadd.f32 %v1631_v62, %v1630_v60 }
 0x39c   :  { %v1633_v1 = vpop.f32.mrf.mxu0  ;;  %v1352_v33 = vpop.f32.mrf.mxu1 }
 0x39d   :  { %v1353_v40 = vadd.f32 %v1352_v33, %v1304_v2  ;;  %v1307_v8 = vadd.f32 %v1632_v0, %v1472_v61 }
 0x39e   :  { %v1634_v3 = vpop.f32.mrf.mxu0  ;;  %v1728_v5 = vpop.f32.mrf.mxu1 }
 0x39f   :  { %v1635_v4 = vadd.f32 %v1634_v3, %v1633_v1  ;;  %v1367_v6 = vmax.f32 %v1353_v40, 0.0 }
 0x3a0   :  { %v1636_v7 = vpop.f32.mrf.mxu0  ;;  %v1355_v10 = vpop.f32.mrf.mxu1 }
 0x3a1   :  { %v1312_v9 = vadd.f32 %v1635_v4, %v1472_v61  ;;  %v1371_v11 = vadd.f32 %v1367_v6, %v1044_v34  ;;  %v1356_v12 = vadd.f32 %v1355_v10, %v1307_v8 }
 0x3a2   :  { %v1637_v13 = vpop.f32.mrf.mxu0 }
 0x3a3   :  { %v1361_v14 = vadd.f32 %v1727_v63, %v1312_v9  ;;  %v1638_v15 = vadd.f32 %v1637_v13, %v1636_v7  ;;  %1375 = vst [vmem:[#allocation9] sm:$0xff] %v1371_v11  ;;  %v1368_v16 = vmax.f32 %v1356_v12, 0.0 }
 0x3a5   :  { %v1369_v18 = vmax.f32 %v1361_v14, 0.0  ;;  %v1315_v19 = vadd.f32 %v1638_v15, %v1472_v61  ;;  %v1372_v20 = vadd.f32 %v1368_v16, %v1045_v46 }
 0x3a7   :  { %v1373_v21 = vadd.f32 %v1369_v18, %v1046_v24  ;;  %v1364_v22 = vadd.f32 %v1728_v5, %v1315_v19  ;;  %1376 = vst [vmem:[#allocation9 + $0x8] sm:$0xff] %v1372_v20 }
 0x3a9   :  { %1377 = vst [vmem:[#allocation9 + $0x10] sm:$0xff] %v1373_v21  ;;  %v1370_v23 = vmax.f32 %v1364_v22, 0.0 }
 0x3ab   :  { %v1374_v26 = vadd.f32 %v1370_v23, %v1047_v55 }
 0x3ad   :  { %1378 = vst [vmem:[#allocation9 + $0x18] sm:$0xff] %v1374_v26 }
 0x3ae   :  { %1908 = shalt.err (!%p1905_p5)
}
 0x3af   :  { %1390 = dma.vmem_to_hbm [thread:$0]  %s1385_s2, 512, %s2015_s3, [#allocation5], %s1927_s22, %s1927_s22, %s1928_s23  }
 0x3b0   :  { %1921 = dma.done.wait [#allocation5], 512  }
 0x3b1   :  { %1922 = vsyncadd [#allocation5], 4294966784 }
 0x3b2   :  { %1394 = vsyncpa [#allocation4], 1 }
 0x3b3   :  { %1395 = vsyncpa [#allocation7], 1 }
 0x3b4   :  { %1396 = vsyncpa [#allocation5], 1 }

</bundles_post_ra>
